<compile_context>
chip_gen: v7x
topology: tpu7x:2x2x1
jax: 0.10.0
libtpu: 0.0.40
codegen_flags: <defaults>
</compile_context>

<pallas_src>
import functools

import jax
import jax.numpy as jnp
from jax.experimental import pallas as pl
from jax.experimental.pallas import tpu as pltpu


def _ca_bn_kernel(x_ref, w1_ref, b1_ref, w2_ref, b2_ref, gamma_ref, beta_ref,
                  o_ref, *, n_batch, c, eps):
    x = x_ref[...].astype(jnp.float32)           # (N*C, hw_tile)
    w1 = w1_ref[...].astype(jnp.float32)         # (N*cmid_p, N*C) block-diag
    b1 = b1_ref[...].astype(jnp.float32)         # (N*cmid_p, 1)
    w2 = w2_ref[...].astype(jnp.float32)         # (N*C, N*cmid_p) block-diag
    b2 = b2_ref[...].astype(jnp.float32)         # (N*C, 1)
    gamma = gamma_ref[...].astype(jnp.float32)   # (C, hw_tile)
    beta = beta_ref[...].astype(jnp.float32)     # (C, hw_tile)

    # Whole-batch 1x1 convs: one MXU matmul each (block-diagonal weights).
    # Precision stays HIGHEST: matmuls are tiny and BN(N=2, eps=1e-5) amplifies
    # matmul rounding near batch-tied features by ~eps^{-1/2}.
    h = jnp.dot(w1, x, preferred_element_type=jnp.float32,
                precision=jax.lax.Precision.HIGHEST) + b1
    h = jnp.maximum(h, 0.0)                      # ReLU, (N*cmid_p, hw_tile)
    z = jnp.dot(w2, h, preferred_element_type=jnp.float32,
                precision=jax.lax.Precision.HIGHEST) + b2

    # Sigmoid as a single EUP tanh (no f32 divide).
    a = 0.5 * jnp.tanh(0.5 * z) + 0.5
    y = x * a + x                                # gated residual, (N*C, hw_tile)

    # BatchNorm1d(C*HW), training-mode forward: per-feature batch statistics
    # (biased variance, eps inside the sqrt), affine gamma/beta.  Stats are
    # computed with static sublane slices of the (N*C, hw) slab; deviations are
    # reused for both the variance and the normalized output (single traversal,
    # no E[y^2]-mean^2 cancellation).
    # TODO(synk): running_mean / running_var buffer updates (stateful training
    # side effect) are not emitted; only the returned tensor is computed.
    inv_n = 1.0 / n_batch
    mean = y[0:c, :]
    for n in range(1, n_batch):
        mean = mean + y[n * c:(n + 1) * c, :]
    mean = mean * inv_n

    devs = [y[n * c:(n + 1) * c, :] - mean for n in range(n_batch)]
    var = devs[0] * devs[0]
    for d in devs[1:]:
        var = var + d * d
    var = var * inv_n
    scale = jax.lax.rsqrt(var + eps) * gamma     # rsqrt on the EUP, fused scale

    for n in range(n_batch):
        o_ref[n * c:(n + 1) * c, :] = (devs[n] * scale + beta).astype(o_ref.dtype)


def _pad_axis_to(a, size, axis):
    pad = size - a.shape[axis]
    if pad <= 0:
        return a
    widths = [(0, 0)] * a.ndim
    widths[axis] = (0, pad)
    return jnp.pad(a, widths)


def _pick_hw_tile(hw, rows, budget_bytes=8 * 1024 * 1024):
    """Largest multiple-of-128 divisor of hw whose per-step footprint fits a
    conservative VMEM budget (~6 live f32 (rows, tile) slabs incl. double
    buffering); keeps blocks well under v7x's 32 MiB scoped VMEM."""
    if hw % 128 != 0:
        return hw                      # must take the full (unpadded) extent
    per_col = rows * 4 * 6
    cands = [d for d in range(128, hw + 1, 128) if hw % d == 0]
    fitting = [d for d in cands if d * per_col <= budget_bytes]
    return max(fitting) if fitting else min(cands)


@functools.partial(jax.jit, static_argnames=("eps",))
def ca_layer_forward(x, w1, b1, w2, b2, gamma, beta, eps=1e-5):
    """CALayer forward: 1x1 convs + sigmoid gate + residual + BatchNorm1d."""
    N, C, H, W = x.shape
    HW = H * W
    cmid = w1.shape[0]
    cmid_p = max(8, ((cmid + 7) // 8) * 8)       # pad mid channels to >=8 sublanes

    # NCHW -> (N*C, HW): contiguous reshape (no transpose, no HBM copy). The
    # whole batch is one lane-dense slab; every store is an unmasked vst.
    x2 = x.reshape(N * C, HW)

    # Zero-pad only the tiny mid-channel weights/bias (exact: zero rows of w1
    # + zero bias rows give zero h rows; matching zero cols of w2 contribute
    # nothing), then lift to block-diagonal whole-batch weights.
    w1p = _pad_axis_to(w1, cmid_p, axis=0)                    # (cmid_p, C)
    b1p = _pad_axis_to(b1.reshape(cmid, 1), cmid_p, axis=0)   # (cmid_p, 1)
    w2p = _pad_axis_to(w2, cmid_p, axis=1)                    # (C, cmid_p)
    eye = jnp.eye(N, dtype=w1.dtype)
    w1_bd = jnp.kron(eye, w1p)                                # (N*cmid_p, N*C)
    w2_bd = jnp.kron(eye, w2p)                                # (N*C, N*cmid_p)
    b1_bd = jnp.tile(b1p, (N, 1))                             # (N*cmid_p, 1)
    b2_bd = jnp.tile(b2.reshape(C, 1), (N, 1))                # (N*C, 1)

    # BN params laid out to match the kernel's (C, HW) feature slabs.
    gamma2 = gamma.reshape(C, HW)
    beta2 = beta.reshape(C, HW)

    hw_tile = _pick_hw_tile(HW, N * C)
    grid = (HW // hw_tile,)

    itemsize = jnp.dtype(x.dtype).itemsize
    cost = pl.CostEstimate(
        flops=int(2 * (N * cmid_p) * (N * C) * HW            # conv1 (block-diag)
                  + 2 * (N * C) * (N * cmid_p) * HW          # conv2 (block-diag)
                  + 14 * N * C * HW),                        # elementwise + BN
        transcendentals=int(N * C * HW + C * HW),            # tanh + rsqrt
        bytes_accessed=int((2 * N * C * HW + 2 * C * HW) * itemsize
                           + (w1_bd.size + w2_bd.size + b1_bd.size + b2_bd.size) * 4),
    )

    out2 = pl.pallas_call(
        functools.partial(_ca_bn_kernel, n_batch=N, c=C, eps=eps),
        out_shape=jax.ShapeDtypeStruct((N * C, HW), x.dtype),
        grid=grid,
        in_specs=[
            pl.BlockSpec((N * C, hw_tile), lambda i: (0, i)),
            pl.BlockSpec((N * cmid_p, N * C), lambda i: (0, 0)),
            pl.BlockSpec((N * cmid_p, 1), lambda i: (0, 0)),
            pl.BlockSpec((N * C, N * cmid_p), lambda i: (0, 0)),
            pl.BlockSpec((N * C, 1), lambda i: (0, 0)),
            pl.BlockSpec((C, hw_tile), lambda i: (0, i)),
            pl.BlockSpec((C, hw_tile), lambda i: (0, i)),
        ],
        out_specs=pl.BlockSpec((N * C, hw_tile), lambda i: (0, i)),
        compiler_params=pltpu.CompilerParams(
            dimension_semantics=("parallel",)),   # BN stats are per-feature ->
        cost_estimate=cost,                       # HW columns are independent
    )(x2, w1_bd, b1_bd, w2_bd, b2_bd, gamma2, beta2)

    # (N*C, HW) -> (N, C*H*W): contiguous reshape == torch's y.view(N, -1).
    return out2.reshape(N, C * HW)


def ca_layer_reference(x, w1, b1, w2, b2, gamma, beta, eps=1e-5):
    """Pure-JAX reference (matches torch CALayer.forward in training mode)."""
    N = x.shape[0]
    h = jnp.einsum("mc,nchw->nmhw", w1, x,
                   precision=jax.lax.Precision.HIGHEST) + b1[None, :, None, None]
    h = jnp.maximum(h, 0.0)
    z = jnp.einsum("cm,nmhw->nchw", w2, h,
                   precision=jax.lax.Precision.HIGHEST) + b2[None, :, None, None]
    a = jax.nn.sigmoid(z)
    y = x * a + x
    y = y.reshape(N, -1)
    mean = jnp.mean(y, axis=0, keepdims=True)
    var = jnp.mean((y - mean) ** 2, axis=0, keepdims=True)  # biased, torch BN
    return (y - mean) / jnp.sqrt(var + eps) * gamma[None, :] + beta[None, :]


if __name__ == "__main__":
    key = jax.random.PRNGKey(0)
    ks = jax.random.split(key, 7)

    # BatchNorm1d(4096) requires C*H*W == 4096; reduction=8 requires C >= 8.
    N, C, H, W = 2, 16, 16, 16
    reduction = 8
    cmid = C // reduction  # 2

    x = jax.random.normal(ks[0], (N, C, H, W), dtype=jnp.float32)
    w1 = jax.random.normal(ks[1], (cmid, C), dtype=jnp.float32) * (1.0 / C) ** 0.5
    b1 = jax.random.normal(ks[2], (cmid,), dtype=jnp.float32) * 0.1
    w2 = jax.random.normal(ks[3], (C, cmid), dtype=jnp.float32) * (1.0 / cmid) ** 0.5
    b2 = jax.random.normal(ks[4], (C,), dtype=jnp.float32) * 0.1
    gamma = 1.0 + 0.1 * jax.random.normal(ks[5], (C * H * W,), dtype=jnp.float32)
    beta = 0.1 * jax.random.normal(ks[6], (C * H * W,), dtype=jnp.float32)

    out = ca_layer_forward(x, w1, b1, w2, b2, gamma, beta)
    out = jax.block_until_ready(out)

    ref = ca_layer_reference(x, w1, b1, w2, b2, gamma, beta)
    assert out.shape == (N, C * H * W)
    assert jnp.allclose(out, ref, atol=2e-4, rtol=1e-3), \
        float(jnp.max(jnp.abs(out - ref)))

    print("KERNEL_OK")
</pallas_src>

<mosaic_0001>
module attributes {stable_mosaic.version = 11 : i64} {
  func.func @_ca_bn_kernel(%arg0: i32, %arg1: memref<32x256xf32, #tpu.memory_space<vmem>>, %arg2: memref<16x32xf32, #tpu.memory_space<vmem>>, %arg3: memref<16x1xf32, #tpu.memory_space<vmem>>, %arg4: memref<32x16xf32, #tpu.memory_space<vmem>>, %arg5: memref<32x1xf32, #tpu.memory_space<vmem>>, %arg6: memref<16x256xf32, #tpu.memory_space<vmem>>, %arg7: memref<16x256xf32, #tpu.memory_space<vmem>>, %arg8: memref<32x256xf32, #tpu.memory_space<vmem>>) attributes {dimension_semantics = [#tpu.dimension_semantics<parallel>], iteration_bounds = array<i64: 1>, scalar_prefetch = 0 : i64, scratch_operands = 0 : i64, tpu.core_type = #tpu.core_type<tc>, window_params = [{transform_indices = @transform_0, window_bounds = array<i64: 32, 256>}, {pipeline_mode = #tpu.pipeline_mode<synchronous>, transform_indices = @transform_1, window_bounds = array<i64: 16, 32>}, {pipeline_mode = #tpu.pipeline_mode<synchronous>, transform_indices = @transform_2, window_bounds = array<i64: 16, 1>}, {pipeline_mode = #tpu.pipeline_mode<synchronous>, transform_indices = @transform_3, window_bounds = array<i64: 32, 16>}, {pipeline_mode = #tpu.pipeline_mode<synchronous>, transform_indices = @transform_4, window_bounds = array<i64: 32, 1>}, {transform_indices = @transform_5, window_bounds = array<i64: 16, 256>}, {transform_indices = @transform_6, window_bounds = array<i64: 16, 256>}, {transform_indices = @transform_7, window_bounds = array<i64: 32, 256>}]} {
    %c0 = arith.constant 0 : index
    %c0_0 = arith.constant 0 : index
    %0 = vector.load %arg1[%c0, %c0_0] : memref<32x256xf32, #tpu.memory_space<vmem>>, vector<32x256xf32>
    %c0_1 = arith.constant 0 : index
    %c0_2 = arith.constant 0 : index
    %1 = vector.load %arg2[%c0_1, %c0_2] : memref<16x32xf32, #tpu.memory_space<vmem>>, vector<16x32xf32>
    %c0_3 = arith.constant 0 : index
    %c0_4 = arith.constant 0 : index
    %2 = vector.load %arg3[%c0_3, %c0_4] : memref<16x1xf32, #tpu.memory_space<vmem>>, vector<16x1xf32>
    %c0_5 = arith.constant 0 : index
    %c0_6 = arith.constant 0 : index
    %3 = vector.load %arg4[%c0_5, %c0_6] : memref<32x16xf32, #tpu.memory_space<vmem>>, vector<32x16xf32>
    %c0_7 = arith.constant 0 : index
    %c0_8 = arith.constant 0 : index
    %4 = vector.load %arg5[%c0_7, %c0_8] : memref<32x1xf32, #tpu.memory_space<vmem>>, vector<32x1xf32>
    %c0_9 = arith.constant 0 : index
    %c0_10 = arith.constant 0 : index
    %5 = vector.load %arg6[%c0_9, %c0_10] : memref<16x256xf32, #tpu.memory_space<vmem>>, vector<16x256xf32>
    %c0_11 = arith.constant 0 : index
    %c0_12 = arith.constant 0 : index
    %6 = vector.load %arg7[%c0_11, %c0_12] : memref<16x256xf32, #tpu.memory_space<vmem>>, vector<16x256xf32>
    %cst = arith.constant dense<0.000000e+00> : vector<16x256xf32>
    %7 = tpu.matmul %1, %0, %cst {dimension_numbers = #tpu.dot_dimension_numbers<[1], [0], [0], [1], [0, 0, 1, 1], [], []>, precision = #tpu.contract_precision<fp32>} : vector<16x32xf32>, vector<32x256xf32>, vector<16x256xf32> -> vector<16x256xf32>
    %8 = vector.broadcast %2 : vector<16x1xf32> to vector<16x256xf32>
    %9 = arith.addf %7, %8 : vector<16x256xf32>
    %cst_13 = arith.constant 0.000000e+00 : f32
    %10 = vector.broadcast %cst_13 : f32 to vector<16x256xf32>
    %11 = arith.maximumf %9, %10 : vector<16x256xf32>
    %cst_14 = arith.constant dense<0.000000e+00> : vector<32x256xf32>
    %12 = tpu.matmul %3, %11, %cst_14 {dimension_numbers = #tpu.dot_dimension_numbers<[1], [0], [0], [1], [0, 0, 1, 1], [], []>, precision = #tpu.contract_precision<fp32>} : vector<32x16xf32>, vector<16x256xf32>, vector<32x256xf32> -> vector<32x256xf32>
    %13 = vector.broadcast %4 : vector<32x1xf32> to vector<32x256xf32>
    %14 = arith.addf %12, %13 : vector<32x256xf32>
    %cst_15 = arith.constant 5.000000e-01 : f32
    %15 = vector.broadcast %cst_15 : f32 to vector<32x256xf32>
    %16 = arith.mulf %15, %14 : vector<32x256xf32>
    %17 = math.tanh %16 : vector<32x256xf32>
    %cst_16 = arith.constant 5.000000e-01 : f32
    %18 = vector.broadcast %cst_16 : f32 to vector<32x256xf32>
    %19 = arith.mulf %18, %17 : vector<32x256xf32>
    %cst_17 = arith.constant 5.000000e-01 : f32
    %20 = vector.broadcast %cst_17 : f32 to vector<32x256xf32>
    %21 = arith.addf %19, %20 : vector<32x256xf32>
    %22 = arith.mulf %0, %21 : vector<32x256xf32>
    %23 = arith.addf %22, %0 : vector<32x256xf32>
    %24 = vector.extract_strided_slice %23 {offsets = [0, 0], sizes = [16, 256], strides = [1, 1]} : vector<32x256xf32> to vector<16x256xf32>
    %25 = vector.extract_strided_slice %23 {offsets = [16, 0], sizes = [16, 256], strides = [1, 1]} : vector<32x256xf32> to vector<16x256xf32>
    %26 = arith.addf %24, %25 : vector<16x256xf32>
    %cst_18 = arith.constant 5.000000e-01 : f32
    %27 = vector.broadcast %cst_18 : f32 to vector<16x256xf32>
    %28 = arith.mulf %26, %27 : vector<16x256xf32>
    %29 = vector.extract_strided_slice %23 {offsets = [0, 0], sizes = [16, 256], strides = [1, 1]} : vector<32x256xf32> to vector<16x256xf32>
    %30 = arith.subf %29, %28 : vector<16x256xf32>
    %31 = vector.extract_strided_slice %23 {offsets = [16, 0], sizes = [16, 256], strides = [1, 1]} : vector<32x256xf32> to vector<16x256xf32>
    %32 = arith.subf %31, %28 : vector<16x256xf32>
    %33 = arith.mulf %30, %30 : vector<16x256xf32>
    %34 = arith.mulf %32, %32 : vector<16x256xf32>
    %35 = arith.addf %33, %34 : vector<16x256xf32>
    %cst_19 = arith.constant 5.000000e-01 : f32
    %36 = vector.broadcast %cst_19 : f32 to vector<16x256xf32>
    %37 = arith.mulf %35, %36 : vector<16x256xf32>
    %cst_20 = arith.constant 9.99999974E-6 : f32
    %38 = vector.broadcast %cst_20 : f32 to vector<16x256xf32>
    %39 = arith.addf %37, %38 : vector<16x256xf32>
    %40 = math.rsqrt %39 : vector<16x256xf32>
    %41 = arith.mulf %40, %5 : vector<16x256xf32>
    %42 = arith.mulf %30, %41 : vector<16x256xf32>
    %43 = arith.addf %42, %6 : vector<16x256xf32>
    %c0_21 = arith.constant 0 : index
    %c0_22 = arith.constant 0 : index
    %44 = vector.load %arg8[%c0_21, %c0_22] : memref<32x256xf32, #tpu.memory_space<vmem>>, vector<16x256xf32>
    tpu.vector_store %arg8[%c0_21, %c0_22], %43 {strides = array<i32>} : memref<32x256xf32, #tpu.memory_space<vmem>>, vector<16x256xf32>,
    %45 = arith.mulf %32, %41 : vector<16x256xf32>
    %46 = arith.addf %45, %6 : vector<16x256xf32>
    %c16 = arith.constant 16 : index
    %c0_23 = arith.constant 0 : index
    %47 = vector.load %arg8[%c16, %c0_23] : memref<32x256xf32, #tpu.memory_space<vmem>>, vector<16x256xf32>
    tpu.vector_store %arg8[%c16, %c0_23], %46 {strides = array<i32>} : memref<32x256xf32, #tpu.memory_space<vmem>>, vector<16x256xf32>,
    return
  }
  func.func @transform_0(%arg0: i32) -> (i32, i32) {
    %c0_i32 = arith.constant 0 : i32
    %c0_i32_0 = arith.constant 0 : i32
    return %c0_i32, %arg0 : i32, i32
  }
  func.func @transform_1(%arg0: i32) -> (i32, i32) {
    %c0_i32 = arith.constant 0 : i32
    %c0_i32_0 = arith.constant 0 : i32
    %c0_i32_1 = arith.constant 0 : i32
    return %c0_i32, %c0_i32_0 : i32, i32
  }
  func.func @transform_2(%arg0: i32) -> (i32, i32) {
    %c0_i32 = arith.constant 0 : i32
    %c0_i32_0 = arith.constant 0 : i32
    %c0_i32_1 = arith.constant 0 : i32
    return %c0_i32, %c0_i32_0 : i32, i32
  }
  func.func @transform_3(%arg0: i32) -> (i32, i32) {
    %c0_i32 = arith.constant 0 : i32
    %c0_i32_0 = arith.constant 0 : i32
    %c0_i32_1 = arith.constant 0 : i32
    return %c0_i32, %c0_i32_0 : i32, i32
  }
  func.func @transform_4(%arg0: i32) -> (i32, i32) {
    %c0_i32 = arith.constant 0 : i32
    %c0_i32_0 = arith.constant 0 : i32
    %c0_i32_1 = arith.constant 0 : i32
    return %c0_i32, %c0_i32_0 : i32, i32
  }
  func.func @transform_5(%arg0: i32) -> (i32, i32) {
    %c0_i32 = arith.constant 0 : i32
    %c0_i32_0 = arith.constant 0 : i32
    return %c0_i32, %arg0 : i32, i32
  }
  func.func @transform_6(%arg0: i32) -> (i32, i32) {
    %c0_i32 = arith.constant 0 : i32
    %c0_i32_0 = arith.constant 0 : i32
    return %c0_i32, %arg0 : i32, i32
  }
  func.func @transform_7(%arg0: i32) -> (i32, i32) {
    %c0_i32 = arith.constant 0 : i32
    %c0_i32_0 = arith.constant 0 : i32
    return %c0_i32, %arg0 : i32, i32
  }
}

</mosaic_0001>

<bundles_post_ra>
// kernel: ca_layer_forward.1
= control target key start
LH: loop header
LB: loop body
LE: loop exit
PB: predicated region body
PF: predicated region fallthrough
CT: control target
= control target key end

     0   :  { %v1632_v3 = vmov 0.0   ;;  %vm64_vm0 = vcmask 261120   ;;  %v1633_v4 = vmov 0   ;;  %vm687_vm1 = vcmask 130048   ;;  %s2022_s0 = inlined_call_operand.vmem [shape: f32[32,256], index: 0, kind: input, shape index: {}]   ;;  %s2023_s1 = inlined_call_operand.vmem [shape: f32[16,32], index: 1, kind: input, shape index: {}]   ;;  %s2024_s2 = inlined_call_operand.vmem [shape: f32[16,1], index: 2, kind: input, shape index: {}]   ;;  %s2025_s4 = inlined_call_operand.vmem [shape: f32[32,1], index: 4, kind: input, shape index: {}]   ;;  %s2026_s3 = inlined_call_operand.vmem [shape: f32[32,16], index: 3, kind: input, shape index: {}]   ;;  %s2027_s5 = inlined_call_operand.vmem [shape: f32[16,256], index: 5, kind: input, shape index: {}]   ;;  %s2028_s6 = inlined_call_operand.vmem [shape: f32[16,256], index: 6, kind: input, shape index: {}]   ;;  %s2029_s7 = inlined_call_operand.vmem [shape: f32[32,256], index: 7, kind: output, shape index: {}]  }
   0x1   :  { %v1677_v0 = vld [vmem:[%s2022_s0 + $0x8] sm:$0xff]  ;;  %v1682_v1 = vld [vmem:[%s2022_s0 + $0x18] sm:$0xff]  ;;  %v1687_v2 = vld [vmem:[%s2022_s0] sm:$0xff]  ;;  %143 = vmatprep.mubr.f32.mxu0 %v1632_v3  ;;  %1606 = vset.pattern.permute.xlu0 %v1633_v4 }
   0x2   :  { %v71_v5 = vand.u32 4294901760, %v1677_v0  ;;  %v75_v6 = vand.u32 4294901760, %v1682_v1  ;;  %v1695_v7 = vld [vmem:[%s2022_s0 + $0x10] sm:$0xff]  ;;  %v73_v8 = vand.u32 4294901760, %v1687_v2  ;;  %v1701_v9 = vld [vmem:[%s2022_s0 + $0x28] sm:$0xff]  ;;  %v1706_v10 = vld [vmem:[%s2022_s0 + $0x38] sm:$0xff]  ;;  %904 = vmatprep.mubr.f32.mxu1 %v1632_v3  ;;  %1607 = vset.pattern.permute.xlu1 %v1633_v4 }
   0x3   :  { %v77_v11 = vand.u32 4294901760, %v1695_v7  ;;  %v79_v12 = vand.u32 4294901760, %v1701_v9  ;;  %v83_v13 = vand.u32 4294901760, %v1706_v10  ;;  %v1715_v14 = vld [vmem:[%s2022_s0 + $0x20] sm:$0xff]  ;;  %v1720_v15 = vld [vmem:[%s2022_s0 + $0x30] sm:$0xff]  ;;  %v37_v30 = vld [vmem:[%s2024_s2 + $0x8] sm:$0xff] }
   0x4   :  { %v34_v16 = vld [vmem:[%s2023_s1] sm:$0xff]  ;;  %v1725_v17 = vpack.c.bf16 %v75_v6, %v71_v5  ;;  %v1728_v18 = vsub.f32 %v1677_v0, %v71_v5  ;;  %v1731_v19 = vsub.f32 %v1682_v1, %v75_v6  ;;  %v1734_v20 = vsub.f32 %v1687_v2, %v73_v8  ;;  %v35_v35 = vld [vmem:[%s2023_s1 + $0x8] sm:$0xff]  ;;  %v44_v48 = vld [vmem:[%s2025_s4 + $0x10] sm:$0xff] }
   0x5   :  { %v36_v21 = vld [vmem:[%s2024_s2] sm:$0xff]  ;;  %v1739_v22 = vpack.c.bf16 %v77_v11, %v73_v8  ;;  %v1742_v23 = vsub.f32 %v1695_v7, %v77_v11  ;;  %v1744_v24 = vpack.c.bf16 %v83_v13, %v79_v12  ;;  %v1747_v25 = vsub.f32 %v1701_v9, %v79_v12 }
   0x6   :  { %56 = vperm.xlu0 %1606, %v36_v21   ;;  %1459 = vmatprep.subr.bf16.mxu0 %v1725_v17  ;;  %v1751_v26 = vsub.f32 %v1706_v10, %v83_v13  ;;  %v81_v27 = vand.u32 4294901760, %v1715_v14  ;;  %v85_v28 = vand.u32 4294901760, %v1720_v15  ;;  %v66_v29 = vsel %vm64_vm0, %v34_v16, 0 }
   0x7   :  { %1461 = vmatpush1.bf16.msra.mxu0 %v1739_v22  ;;  %v1760_v31 = vand.u32 4294901760, %v66_v29  ;;  %v168_v32 = vand.u32 4294901760, %v1728_v18  ;;  %v180_v33 = vand.u32 4294901760, %v1731_v19  ;;  %v174_v34 = vand.u32 4294901760, %v1734_v20 }
   0x8   :  { %1463 = vmatprep.subr.bf16.mxu0 %v1744_v24  ;;  %v1769_v36 = vpack.c.bf16 %v85_v28, %v81_v27  ;;  %v1772_v37 = vsub.f32 %v1715_v14, %v81_v27  ;;  %v1775_v38 = vsub.f32 %v1720_v15, %v85_v28  ;;  %v186_v39 = vand.u32 4294901760, %v1742_v23 }
   0x9   :  { %v1779_v40 = vsub.f32 %v66_v29, %v1760_v31  ;;  %v169_v41 = vsub.f32 %v1728_v18, %v168_v32  ;;  %v181_v42 = vsub.f32 %v1731_v19, %v180_v33  ;;  %v175_v43 = vsub.f32 %v1734_v20, %v174_v34 }
   0xa   :  { %61 = vperm.xlu0 %1606, %v37_v30   ;;  %v187_v44 = vsub.f32 %v1742_v23, %v186_v39  ;;  %v69_v45 = vsel %vm64_vm0, %v35_v35, 0  ;;  %v192_v46 = vand.u32 4294901760, %v1747_v25  ;;  %v204_v47 = vand.u32 4294901760, %v1751_v26 }
   0xb   :  { %1465 = vmatpush1.bf16.msra.mxu0 %v1769_v36  ;;  %v146_v49 = vand.u32 4294901760, %v1779_v40  ;;  %v170_v50 = vand.u32 4294901760, %v169_v41  ;;  %v182_v51 = vand.u32 4294901760, %v181_v42  ;;  %v176_v52 = vand.u32 4294901760, %v175_v43 }
   0xc   :  { %v188_v53 = vand.u32 4294901760, %v187_v44  ;;  %v1801_v54 = vand.u32 4294901760, %v69_v45  ;;  %v193_v55 = vsub.f32 %v1747_v25, %v192_v46  ;;  %v205_v56 = vsub.f32 %v1751_v26, %v204_v47 }
   0xd   :  { %v147_v57 = vsub.f32 %v1779_v40, %v146_v49  ;;  %v1466_v58 = vpack.c.bf16 %v182_v51, %v170_v50  ;;  %v198_v59 = vand.u32 4294901760, %v1772_v37  ;;  %v210_v60 = vand.u32 4294901760, %v1775_v38 }
   0xe   :  { %679 = vperm.xlu0 %1606, %v44_v48   ;;  %v1468_v61 = vpack.c.bf16 %v188_v53, %v176_v52  ;;  %v156_v62 = vsub.f32 %v69_v45, %v1801_v54  ;;  %v194_v63 = vand.u32 4294901760, %v193_v55  ;;  %v206_v4 = vand.u32 4294901760, %v205_v56 }
   0xf   :  { %v148_v5 = vand.u32 4294901760, %v147_v57  ;;  %1467 = vmatprep.subr.bf16.mxu0 %v1466_v58  ;;  %v199_v6 = vsub.f32 %v1772_v37, %v198_v59  ;;  %v211_v8 = vsub.f32 %v1775_v38, %v210_v60  ;;  %v1474_v29 = vpack.c.bf16 %v1731_v19, %v1728_v18  ;;  %v43_v19 = vld [vmem:[%s2025_s4 + $0x8] sm:$0xff] }
  0x10   :  { %v157_v11 = vand.u32 4294901760, %v156_v62  ;;  %v1470_v12 = vpack.c.bf16 %v206_v4, %v194_v63  ;;  %v1476_v30 = vpack.c.bf16 %v1742_v23, %v1734_v20  ;;  %v1478_v35 = vpack.c.bf16 %v1751_v26, %v1747_v25  ;;  %v45_v20 = vld [vmem:[%s2025_s4 + $0x18] sm:$0xff] }
  0x11   :  { %149 = vmatmul.mubr.f32.vlgmr.msra.gmra.mrb[0].mxu0 %v148_v5  ;;  %v200_v13 = vand.u32 4294901760, %v199_v6  ;;  %v212_v16 = vand.u32 4294901760, %v211_v8  ;;  %v1480_v41 = vpack.c.bf16 %v1775_v38, %v1772_v37  ;;  %v1490_v25 = vpack.c.bf16 %v180_v33, %v168_v32 }
  0x12   :  { %1469 = vmatpush1.bf16.msra.mxu0 %v1468_v61  ;;  %154 = vmatprep.mubr.f32.mxu0 %v1632_v3  ;;  %v158_v21 = vsub.f32 %v156_v62, %v157_v11  ;;  %v1492_v26 = vpack.c.bf16 %v186_v39, %v174_v34  ;;  %v1494_v37 = vpack.c.bf16 %v204_v47, %v192_v46  ;;  %v40_v39 = vld [vmem:[%s2026_s3 + $0x10] sm:$0xff] }
  0x13   :  { %1471 = vmatprep.subr.bf16.mxu0 %v1470_v12  ;;  %v1472_v27 = vpack.c.bf16 %v212_v16, %v200_v13  ;;  %v1496_v18 = vpack.c.bf16 %v210_v60, %v198_v59  ;;  %v695_v45 = vsel %vm687_vm1, %v40_v39, 0 }
  0x14   :  { %v159_v28 = vand.u32 4294901760, %v158_v21  ;;  %v1886_v56 = vand.u32 4294901760, %v695_v45 }
  0x16   :  { %160 = vmatmul.mubr.f32.gmra.mrb[2].mxu0 %v159_v28  ;;  %v1893_v8 = vsub.f32 %v695_v45, %v1886_v56 }
  0x17   :  { %1473 = vmatpush1.bf16.msra.mxu0 %v1472_v27  ;;  %270 = vmatprep.mubr.f32.mxu0 %v1632_v3 }
  0x18   :  { %1475 = vmatprep.subr.bf16.mxu0 %v1474_v29 }
  0x1a   :  { %272 = vmatmul.mubr.f32.vlgmr.msra.gmra.mrb[0].mxu0 %v1760_v31 }
  0x1b   :  { %1477 = vmatpush1.bf16.msra.mxu0 %v1476_v30  ;;  %277 = vmatprep.mubr.f32.mxu0 %v1632_v3 }
  0x1c   :  { %1479 = vmatprep.subr.bf16.mxu0 %v1478_v35 }
  0x1e   :  { %279 = vmatmul.mubr.f32.gmra.mrb[2].mxu0 %v1801_v54 }
  0x1f   :  { %1481 = vmatpush1.bf16.msra.mxu0 %v1480_v41  ;;  %365 = vmatprep.mubr.f32.mxu0 %v1632_v3 }
  0x20   :  { %1483 = vmatprep.subr.bf16.mxu0 %v1725_v17 }
  0x22   :  { %368 = vmatmul.mubr.f32.vlgmr.msra.gmra.mrb[0].mxu0 %v1779_v40 }
  0x23   :  { %1485 = vmatpush1.bf16.msra.mxu0 %v1739_v22  ;;  %373 = vmatprep.mubr.f32.mxu0 %v1632_v3 }
  0x24   :  { %1487 = vmatprep.subr.bf16.mxu0 %v1744_v24 }
  0x26   :  { %376 = vmatmul.mubr.f32.gmra.mrb[2].mxu0 %v156_v62 }
  0x27   :  { %1489 = vmatpush1.bf16.msra.mxu0 %v1769_v36  ;;  %454 = vmatprep.mubr.f32.mxu0 %v1632_v3 }
  0x28   :  { %1491 = vmatprep.subr.bf16.mxu0 %v1490_v25 }
  0x2a   :  { %458 = vmatmul.mubr.f32.vlgmr.msra.gmra.mrb[0].mxu0 %v146_v49 }
  0x2b   :  { %1493 = vmatpush1.bf16.msra.mxu0 %v1492_v26  ;;  %463 = vmatprep.mubr.f32.mxu0 %v1632_v3 }
  0x2c   :  { %1495 = vmatprep.subr.bf16.mxu0 %v1494_v37 }
  0x2e   :  { %467 = vmatmul.mubr.f32.gmra.mrb[2].mxu0 %v157_v11  ;;  %v41_v11 = vld [vmem:[%s2026_s3 + $0x18] sm:$0xff] }
  0x2f   :  { %1497 = vmatpush1.bf16.msra.mxu0 %v1496_v18  ;;  %561 = vmatprep.mubr.f32.mxu0 %v1632_v3  ;;  %v698_v41 = vsel %vm687_vm1, %v41_v11, 0  ;;  %v793_v18 = vand.u32 4294901760, %v1893_v8 }
  0x30   :  { %1499 = vmatprep.subr.bf16.mxu0 %v1725_v17  ;;  %v42_v17 = vld [vmem:[%s2025_s4] sm:$0xff] }
  0x31   :  { %669 = vperm.xlu1 %1607, %v42_v17  }
  0x32   :  { %563 = vmatmul.mubr.f32.vlgmr.msra.gmra.mrb[0].mxu0 %v1760_v31 }
  0x33   :  { %1501 = vmatpush1.bf16.msra.mxu0 %v1739_v22  ;;  %568 = vmatprep.mubr.f32.mxu0 %v1632_v3  ;;  %v38_v22 = vld [vmem:[%s2026_s3] sm:$0xff] }
  0x34   :  { %1503 = vmatprep.subr.bf16.mxu0 %v1744_v24  ;;  %v689_v23 = vsel %vm687_vm1, %v38_v22, 0  ;;  %v39_v24 = vld [vmem:[%s2026_s3 + $0x8] sm:$0xff]  ;;  %v1909_v22 = vand.u32 4294901760, %v698_v41 }
  0x35   :  { %674 = vperm.xlu1 %1607, %v43_v19   ;;  %v692_v32 = vsel %vm687_vm1, %v39_v24, 0 }
  0x36   :  { %570 = vmatmul.mubr.f32.gmra.mrb[2].mxu0 %v1801_v54  ;;  %v1876_v38 = vand.u32 4294901760, %v692_v32 }
  0x37   :  { %1505 = vmatpush1.bf16.msra.mxu0 %v1769_v36  ;;  %648 = vmatprep.mubr.f32.mxu0 %v1632_v3 }
  0x38   :  { %v1884_v50 = vsub.f32 %v692_v32, %v1876_v38 }
  0x39   :  { %684 = vperm.xlu1 %1607, %v45_v20  }
  0x3a   :  { %650 = vmatmul.mubr.f32.vlgmr.msra.gmra.mrb[0].mxu0 %v1760_v31  ;;  %v1870_v31 = vand.u32 4294901760, %v689_v23  ;;  %v782_v62 = vand.u32 4294901760, %v1884_v50 }
  0x3b   :  { %655 = vmatprep.mubr.f32.mxu0 %v1632_v3 }
  0x3c   :  { %v1874_v36 = vsub.f32 %v689_v23, %v1870_v31  ;;  %v783_v28 = vsub.f32 %v1884_v50, %v782_v62 }
  0x3e   :  { %657 = vmatmul.mubr.f32.gmra.mrb[2].mxu0 %v1801_v54  ;;  %v771_v49 = vand.u32 4294901760, %v1874_v36 }
  0x3f   :  { %768 = vmatprep.mubr.f32.mxu0 %v1632_v3 }
  0x40   :  { %v772_v61 = vsub.f32 %v1874_v36, %v771_v49 }
  0x42   :  { %v773_v27 = vand.u32 4294901760, %v772_v61 }
  0x85   :  { %v57_v33 = vpop.permute.xlu0 %56 }
  0x89   :  { %v62_v46 = vpop.permute.xlu0 %61 }
  0x8d   :  { %v680_v11 = vpop.permute.xlu0 %679 }
 0x10d   :  { %v651_v34 = vpop.f32.mrb[0].mxu0 }
 0x10e   :  { %v1532_v40 = vadd.f32 %v651_v34, %v57_v33  ;;  %v653_v42 = vpop.f32.mrb[1].mxu0 }
 0x10f   :  { %v1533_v43 = vadd.f32 %v653_v42, %v57_v33  ;;  %v784_v33 = vand.u32 4294901760, %v783_v28  ;;  %v803_v42 = vsub.f32 %v698_v41, %v1909_v22 }
 0x110   :  { %v663_v44 = vmax.f32 %v1532_v40, 0.0  ;;  %v794_v40 = vsub.f32 %v1893_v8, %v793_v18 }
 0x111   :  { %v664_v47 = vmax.f32 %v1533_v43, 0.0  ;;  %v658_v48 = vpop.f32.mrb[2].mxu0  ;;  %v804_v45 = vand.u32 4294901760, %v803_v42 }
 0x112   :  { %v702_v51 = vand.u32 4294901760, %v663_v44  ;;  %v1534_v52 = vadd.f32 %v658_v48, %v62_v46  ;;  %v660_v53 = vpop.f32.mrb[3].mxu0 }
 0x113   :  { %v700_v54 = vand.u32 4294901760, %v664_v47  ;;  %v1535_v55 = vadd.f32 %v660_v53, %v62_v46  ;;  %v795_v46 = vand.u32 4294901760, %v794_v40 }
 0x114   :  { %v820_v57 = vsub.f32 %v663_v44, %v702_v51  ;;  %v665_v58 = vmax.f32 %v1534_v52, 0.0 }
 0x115   :  { %v814_v59 = vsub.f32 %v664_v47, %v700_v54  ;;  %v666_v60 = vmax.f32 %v1535_v55, 0.0  ;;  %v805_v47 = vsub.f32 %v803_v42, %v804_v45  ;;  %v670_v55 = vpop.permute.xlu1 %669 }
 0x116   :  { %v821_v63 = vand.u32 4294901760, %v820_v57  ;;  %v706_v4 = vand.u32 4294901760, %v665_v58 }
 0x117   :  { %v815_v5 = vand.u32 4294901760, %v814_v59  ;;  %v704_v6 = vand.u32 4294901760, %v666_v60  ;;  %v806_v48 = vand.u32 4294901760, %v805_v47 }
 0x118   :  { %v1898_v12 = vpack.c.bf16 %v706_v4, %v702_v51  ;;  %v832_v13 = vsub.f32 %v665_v58, %v706_v4  ;;  %v822_v29 = vsub.f32 %v820_v57, %v821_v63 }
 0x119   :  { %v826_v16 = vsub.f32 %v666_v60, %v704_v6  ;;  %v1900_v21 = vpack.c.bf16 %v704_v6, %v700_v54  ;;  %v816_v26 = vsub.f32 %v814_v59, %v815_v5 }
 0x11a   :  { %v833_v30 = vand.u32 4294901760, %v832_v13  ;;  %v1516_v35 = vpack.c.bf16 %v832_v13, %v820_v57  ;;  %v823_v24 = vand.u32 4294901760, %v822_v29 }
 0x11b   :  { %v827_v25 = vand.u32 4294901760, %v826_v16  ;;  %1507 = vmatprep.subr.bf16.mxu0 %v1900_v21  ;;  %v1514_v37 = vpack.c.bf16 %v826_v16, %v814_v59  ;;  %v817_v34 = vand.u32 4294901760, %v816_v26 }
 0x11c   :  { %v834_v17 = vsub.f32 %v832_v13, %v833_v30  ;;  %1509 = vmatpush1.bf16.msra.mxu0 %v1898_v12  ;;  %v1524_v19 = vpack.c.bf16 %v833_v30, %v821_v63 }
 0x11d   :  { %v828_v20 = vsub.f32 %v826_v16, %v827_v25  ;;  %v1522_v23 = vpack.c.bf16 %v827_v25, %v815_v5 }
 0x11e   :  { %v835_v32 = vand.u32 4294901760, %v834_v17 }
 0x11f   :  { %774 = vmatmul.mubr.f32.vlgmr.msra.gmra.mrb[4].mxu0 %v773_v27  ;;  %v829_v39 = vand.u32 4294901760, %v828_v20 }
 0x120   :  { %779 = vmatprep.mubr.f32.mxu0 %v1632_v3  ;;  %v1512_v43 = vpack.c.bf16 %v835_v32, %v823_v24 }
 0x121   :  { %v1510_v44 = vpack.c.bf16 %v829_v39, %v817_v34 }
 0x123   :  { %785 = vmatmul.mubr.f32.gmra.mrb[6].mxu0 %v784_v33  ;;  %1511 = vmatprep.subr.bf16.mxu0 %v1510_v44 }
 0x124   :  { %1530 = vmatprep.subr.bf16.mxu1 %v1510_v44  ;;  %1513 = vmatpush1.bf16.msra.mxu0 %v1512_v43 }
 0x125   :  { %1531 = vmatpush1.bf16.msra.mxu1 %v1512_v43  ;;  %790 = vmatprep.mubr.f32.mxu0 %v1632_v3 }
 0x126   :  { %1515 = vmatprep.subr.bf16.mxu1 %v1514_v37 }
 0x127   :  { %796 = vmatmul.mubr.f32.gmra.mrb[8].mxu0 %v795_v46 }
 0x128   :  { %906 = vmatmul.mubr.f32.vlgmr.msra.gmra.mrb[0].mxu1 %v1876_v38  ;;  %801 = vmatprep.mubr.f32.mxu0 %v1632_v3 }
 0x129   :  { %1517 = vmatpush1.bf16.msra.mxu1 %v1516_v35  ;;  %911 = vmatprep.mubr.f32.mxu1 %v1632_v3 }
 0x12a   :  { %1519 = vmatprep.subr.bf16.mxu1 %v1900_v21 }
 0x12b   :  { %807 = vmatmul.mubr.f32.gmra.mrb[10].mxu0 %v806_v48 }
 0x12c   :  { %913 = vmatmul.mubr.f32.gmra.mrb[2].mxu1 %v1886_v56  ;;  %897 = vmatprep.mubr.f32.mxu0 %v1632_v3 }
 0x12d   :  { %918 = vmatprep.mubr.f32.mxu1 %v1632_v3 }
 0x12f   :  { %899 = vmatmul.mubr.f32.vlgmr.msra.gmra.mrb[4].mxu0 %v1870_v31 }
 0x130   :  { %920 = vmatmul.mubr.f32.gmra.mrb[4].mxu1 %v1909_v22 }
 0x131   :  { %998 = vmatprep.mubr.f32.mxu1 %v1632_v3 }
 0x134   :  { %1001 = vmatmul.mubr.f32.vlgmr.msra.gmra.mrb[6].mxu1 %v1874_v36 }
 0x135   :  { %1521 = vmatpush1.bf16.msra.mxu1 %v1898_v12  ;;  %1006 = vmatprep.mubr.f32.mxu1 %v1632_v3 }
 0x136   :  { %1523 = vmatprep.subr.bf16.mxu1 %v1522_v23 }
 0x138   :  { %1009 = vmatmul.mubr.f32.gmra.mrb[0].mxu1 %v1884_v50 }
 0x139   :  { %1014 = vmatprep.mubr.f32.mxu1 %v1632_v3 }
 0x13c   :  { %1017 = vmatmul.mubr.f32.gmra.mrb[2].mxu1 %v1893_v8 }
 0x13d   :  { %1022 = vmatprep.mubr.f32.mxu1 %v1632_v3 }
 0x140   :  { %1025 = vmatmul.mubr.f32.gmra.mrb[4].mxu1 %v803_v42 }
 0x141   :  { %1099 = vmatprep.mubr.f32.mxu1 %v1632_v3 }
 0x144   :  { %1103 = vmatmul.mubr.f32.vlgmr.msra.gmra.mrb[6].mxu1 %v771_v49 }
 0x145   :  { %1525 = vmatpush1.bf16.msra.mxu1 %v1524_v19  ;;  %1108 = vmatprep.mubr.f32.mxu1 %v1632_v3 }
 0x146   :  { %1527 = vmatprep.subr.bf16.mxu1 %v1900_v21 }
 0x148   :  { %1112 = vmatmul.mubr.f32.gmra.mrb[0].mxu1 %v782_v62 }
 0x149   :  { %1117 = vmatprep.mubr.f32.mxu1 %v1632_v3 }
 0x14c   :  { %1121 = vmatmul.mubr.f32.gmra.mrb[2].mxu1 %v793_v18 }
 0x14d   :  { %1126 = vmatprep.mubr.f32.mxu1 %v1632_v3 }
 0x150   :  { %1130 = vmatmul.mubr.f32.gmra.mrb[4].mxu1 %v804_v45 }
 0x151   :  { %1212 = vmatprep.mubr.f32.mxu1 %v1632_v3 }
 0x154   :  { %1214 = vmatmul.mubr.f32.vlgmr.msra.gmra.mrb[6].mxu1 %v1870_v31 }
 0x155   :  { %1529 = vmatpush1.bf16.msra.mxu1 %v1898_v12  ;;  %1219 = vmatprep.mubr.f32.mxu1 %v1632_v3 }
 0x158   :  { %1221 = vmatmul.mubr.f32.gmra.mrb[0].mxu1 %v1876_v38 }
 0x159   :  { %1226 = vmatprep.mubr.f32.mxu1 %v1632_v3 }
 0x15c   :  { %1228 = vmatmul.mubr.f32.gmra.mrb[2].mxu1 %v1886_v56 }
 0x15d   :  { %1233 = vmatprep.mubr.f32.mxu1 %v1632_v3 }
 0x160   :  { %1235 = vmatmul.mubr.f32.gmra.mrb[4].mxu1 %v1909_v22 }
 0x161   :  { %1309 = vmatprep.mubr.f32.mxu1 %v1632_v3 }
 0x164   :  { %1311 = vmatmul.mubr.f32.vlgmr.msra.gmra.mrb[6].mxu1 %v1870_v31 }
 0x165   :  { %1316 = vmatprep.mubr.f32.mxu1 %v1632_v3 }
 0x168   :  { %1318 = vmatmul.mubr.f32.gmra.mrb[0].mxu1 %v1876_v38  ;;  %v675_v38 = vpop.permute.xlu1 %674 }
 0x169   :  { %1323 = vmatprep.mubr.f32.mxu1 %v1632_v3 }
 0x16c   :  { %1325 = vmatmul.mubr.f32.gmra.mrb[2].mxu1 %v1886_v56  ;;  %v685_v27 = vpop.permute.xlu1 %684 }
 0x16d   :  { %1330 = vmatprep.mubr.f32.mxu1 %v1632_v3 }
 0x170   :  { %1332 = vmatmul.mubr.f32.gmra.mrb[4].mxu1 %v1909_v22 }
 0x1f6   :  { %v786_v36 = vpop.f32.mrb[6].mxu0 }
 0x1f7   :  { %v788_v49 = vpop.f32.mrb[7].mxu0  ;;  %v787_v62 = vadd.f32 %v786_v36, %v675_v38 }
 0x1f8   :  { %v789_v63 = vadd.f32 %v788_v49, %v675_v38 }
 0x1fa   :  { %v797_v50 = vpop.f32.mrb[8].mxu0 }
 0x1fb   :  { %v799_v51 = vpop.f32.mrb[9].mxu0  ;;  %v798_v13 = vadd.f32 %v797_v50, %v680_v11 }
 0x1fc   :  { %v800_v21 = vadd.f32 %v799_v51, %v680_v11 }
 0x1fe   :  { %v808_v52 = vpop.f32.mrb[10].mxu0 }
 0x1ff   :  { %v810_v53 = vpop.f32.mrb[11].mxu0  ;;  %v809_v25 = vadd.f32 %v808_v52, %v685_v27 }
 0x200   :  { %v811_v37 = vadd.f32 %v810_v53, %v685_v27 }
 0x202   :  { %v900_v54 = vpop.f32.mrb[4].mxu0 }
 0x203   :  { %v902_v31 = vpop.f32.mrb[5].mxu0  ;;  %v1536_v57 = vadd.f32 %v900_v54, %v670_v55 }
 0x204   :  { %v1538_v58 = vadd.f32 %v902_v31, %v670_v55 }
 0x237   :  { %v1312_v59 = vpop.f32.mrb[6].mxu1 }
 0x238   :  { %v1537_v60 = vadd.f32 %v1536_v57, %v1312_v59  ;;  %v1314_v61 = vpop.f32.mrb[7].mxu1 }
 0x239   :  { %v1539_v56 = vadd.f32 %v1538_v58, %v1314_v61 }
 0x23a   :  { %v1338_v3 = vmul.f32 0.5, %v1537_v60 }
 0x23b   :  { %v1339_v4 = vmul.f32 0.5, %v1539_v56  ;;  %v1319_v5 = vpop.f32.mrb[0].mxu1 }
 0x23c   :  { %1608 = vtanh.f32 %v1338_v3  ;;  %v1541_v6 = vadd.f32 %v1319_v5, %v787_v62  ;;  %v1321_v8 = vpop.f32.mrb[1].mxu1 }
 0x23d   :  { %1610 = vtanh.f32 %v1339_v4  ;;  %v1543_v12 = vadd.f32 %v1321_v8, %v789_v63 }
 0x23e   :  { %v1340_v16 = vmul.f32 0.5, %v1541_v6 }
 0x23f   :  { %v1341_v28 = vmul.f32 0.5, %v1543_v12  ;;  %v1326_v29 = vpop.f32.mrb[2].mxu1 }
 0x240   :  { %1612 = vtanh.f32 %v1340_v16  ;;  %v1545_v30 = vadd.f32 %v1326_v29, %v798_v13  ;;  %v1328_v35 = vpop.f32.mrb[3].mxu1 }
 0x241   :  { %1614 = vtanh.f32 %v1341_v28  ;;  %v1547_v41 = vadd.f32 %v1328_v35, %v800_v21 }
 0x242   :  { %v1342_v26 = vmul.f32 0.5, %v1545_v30 }
 0x243   :  { %v1343_v18 = vmul.f32 0.5, %v1547_v41  ;;  %v1333_v17 = vpop.f32.mrb[4].mxu1 }
 0x244   :  { %1616 = vtanh.f32 %v1342_v26  ;;  %v1549_v19 = vadd.f32 %v1333_v17, %v809_v25  ;;  %v1335_v20 = vpop.f32.mrb[5].mxu1 }
 0x245   :  { %1618 = vtanh.f32 %v1343_v18  ;;  %v1551_v22 = vadd.f32 %v1335_v20, %v811_v37 }
 0x246   :  { %v1609_v23 = vpop.eup %1608  ;;  %v1344_v24 = vmul.f32 0.5, %v1549_v19 }
 0x247   :  { %v1611_v32 = vpop.eup %1610  ;;  %v1345_v33 = vmul.f32 0.5, %v1551_v22  ;;  %v1354_v34 = vmul.f32 0.5, %v1609_v23 }
 0x248   :  { %1620 = vtanh.f32 %v1344_v24  ;;  %v1355_v40 = vmul.f32 0.5, %v1611_v32 }
 0x249   :  { %1622 = vtanh.f32 %v1345_v33  ;;  %v1362_v43 = vadd.f32 0.5, %v1354_v34 }
 0x24a   :  { %v1613_v39 = vpop.eup %1612  ;;  %v1363_v46 = vadd.f32 0.5, %v1355_v40 }
 0x24b   :  { %v1615_v42 = vpop.eup %1614  ;;  %v1356_v44 = vmul.f32 0.5, %v1613_v39  ;;  %v1370_v50 = vmul.f32 %v1362_v43, %v1687_v2 }
 0x24c   :  { %v1357_v47 = vmul.f32 0.5, %v1615_v42  ;;  %v1371_v54 = vmul.f32 %v1363_v46, %v1677_v0 }
 0x24d   :  { %v1364_v51 = vadd.f32 0.5, %v1356_v44  ;;  %v1378_v61 = vadd.f32 %v1370_v50, %v1687_v2 }
 0x24e   :  { %v1617_v45 = vpop.eup %1616  ;;  %v1365_v31 = vadd.f32 0.5, %v1357_v47  ;;  %v1379_v63 = vadd.f32 %v1371_v54, %v1677_v0 }
 0x24f   :  { %v1619_v48 = vpop.eup %1618  ;;  %v1358_v36 = vmul.f32 0.5, %v1617_v45  ;;  %v1372_v56 = vmul.f32 %v1364_v51, %v1695_v7 }
 0x250   :  { %v1359_v49 = vmul.f32 0.5, %v1619_v48  ;;  %v1373_v4 = vmul.f32 %v1365_v31, %v1682_v1  ;;  %v48_v31 = vld [vmem:[%s2027_s5 + $0x10] sm:$0xff] }
 0x251   :  { %v1366_v52 = vadd.f32 0.5, %v1358_v36  ;;  %v1380_v2 = vadd.f32 %v1372_v56, %v1695_v7  ;;  %v46_v36 = vld [vmem:[%s2027_s5] sm:$0xff] }
 0x252   :  { %v1621_v53 = vpop.eup %1620  ;;  %v1367_v55 = vadd.f32 0.5, %v1359_v49  ;;  %v47_v49 = vld [vmem:[%s2027_s5 + $0x8] sm:$0xff] }
 0x253   :  { %v1623_v57 = vpop.eup %1622  ;;  %v1374_v58 = vmul.f32 %v1366_v52, %v1715_v14  ;;  %v1360_v38 = vmul.f32 0.5, %v1621_v53  ;;  %v50_v53 = vld [vmem:[%s2028_s6] sm:$0xff] }
 0x254   :  { %v1375_v59 = vmul.f32 %v1367_v55, %v1701_v9  ;;  %v1361_v60 = vmul.f32 0.5, %v1623_v57 }
 0x255   :  { %v1382_v62 = vadd.f32 %v1374_v58, %v1715_v14  ;;  %v1368_v3 = vadd.f32 0.5, %v1360_v38  ;;  %v1381_v14 = vadd.f32 %v1373_v4, %v1682_v1  ;;  %v51_v58 = vld [vmem:[%s2028_s6 + $0x8] sm:$0xff]  ;;  %v49_v38 = vld [vmem:[%s2027_s5 + $0x18] sm:$0xff] }
 0x256   :  { %v1383_v5 = vadd.f32 %v1375_v59, %v1701_v9  ;;  %v1369_v6 = vadd.f32 0.5, %v1361_v60 }
 0x257   :  { %v1386_v8 = vadd.f32 %v1382_v62, %v1378_v61  ;;  %v1376_v11 = vmul.f32 %v1368_v3, %v1720_v15 }
 0x258   :  { %v1387_v12 = vadd.f32 %v1383_v5, %v1379_v63  ;;  %v1377_v13 = vmul.f32 %v1369_v6, %v1706_v10  ;;  %v52_v6 = vld [vmem:[%s2028_s6 + $0x10] sm:$0xff] }
 0x259   :  { %v1390_v16 = vmul.f32 0.5, %v1386_v8  ;;  %v1384_v21 = vadd.f32 %v1376_v11, %v1720_v15 }
 0x25a   :  { %v1391_v27 = vmul.f32 0.5, %v1387_v12  ;;  %v1385_v0 = vadd.f32 %v1377_v13, %v1706_v10  ;;  %v53_v13 = vld [vmem:[%s2028_s6 + $0x18] sm:$0xff] }
 0x25b   :  { %v1394_v28 = vsub.f32 %v1378_v61, %v1390_v16  ;;  %v1398_v29 = vsub.f32 %v1382_v62, %v1390_v16  ;;  %v1388_v9 = vadd.f32 %v1384_v21, %v1380_v2 }
 0x25c   :  { %v1395_v30 = vsub.f32 %v1379_v63, %v1391_v27  ;;  %v1399_v35 = vsub.f32 %v1383_v5, %v1391_v27  ;;  %v1389_v41 = vadd.f32 %v1385_v0, %v1381_v14 }
 0x25d   :  { %v1402_v25 = vmul.f32 %v1394_v28, %v1394_v28  ;;  %v1406_v26 = vmul.f32 %v1398_v29, %v1398_v29  ;;  %v1392_v37 = vmul.f32 0.5, %v1388_v9 }
 0x25e   :  { %v1403_v18 = vmul.f32 %v1395_v30, %v1395_v30  ;;  %v1407_v17 = vmul.f32 %v1399_v35, %v1399_v35  ;;  %v1393_v7 = vmul.f32 0.5, %v1389_v41 }
 0x25f   :  { %v1410_v19 = vadd.f32 %v1406_v26, %v1402_v25  ;;  %v1396_v20 = vsub.f32 %v1380_v2, %v1392_v37  ;;  %v1400_v15 = vsub.f32 %v1384_v21, %v1392_v37 }
 0x260   :  { %v1411_v22 = vadd.f32 %v1407_v17, %v1403_v18  ;;  %v1397_v1 = vsub.f32 %v1381_v14, %v1393_v7  ;;  %v1401_v23 = vsub.f32 %v1385_v0, %v1393_v7 }
 0x261   :  { %v1414_v24 = vmul.f32 0.5, %v1410_v19  ;;  %v1404_v10 = vmul.f32 %v1396_v20, %v1396_v20  ;;  %v1408_v32 = vmul.f32 %v1400_v15, %v1400_v15 }
 0x262   :  { %v1415_v33 = vmul.f32 0.5, %v1411_v22  ;;  %v1405_v34 = vmul.f32 %v1397_v1, %v1397_v1  ;;  %v1409_v39 = vmul.f32 %v1401_v23, %v1401_v23 }
 0x263   :  { %v1418_v40 = vadd.f32 1e-05, %v1414_v24  ;;  %v1412_v42 = vadd.f32 %v1408_v32, %v1404_v10 }
 0x264   :  { %v1419_v43 = vadd.f32 1e-05, %v1415_v33  ;;  %v1413_v44 = vadd.f32 %v1409_v39, %v1405_v34 }
 0x265   :  { %1624 = vrsqrt.f32 %v1418_v40  ;;  %v1416_v45 = vmul.f32 0.5, %v1412_v42 }
 0x266   :  { %1626 = vrsqrt.f32 %v1419_v43  ;;  %v1417_v46 = vmul.f32 0.5, %v1413_v44 }
 0x267   :  { %v1420_v47 = vadd.f32 1e-05, %v1416_v45 }
 0x268   :  { %v1421_v48 = vadd.f32 1e-05, %v1417_v46 }
 0x269   :  { %1628 = vrsqrt.f32 %v1420_v47 }
 0x26a   :  { %1630 = vrsqrt.f32 %v1421_v48 }
 0x26f   :  { %v1625_v50 = vpop.eup %1624 }
 0x270   :  { %v1627_v51 = vpop.eup %1626  ;;  %v1426_v52 = vmul.f32 %v1625_v50, %v46_v36 }
 0x271   :  { %v1427_v54 = vmul.f32 %v1627_v51, %v47_v49 }
 0x272   :  { %v1430_v55 = vmul.f32 %v1426_v52, %v1394_v28  ;;  %v1442_v57 = vmul.f32 %v1426_v52, %v1398_v29 }
 0x273   :  { %v1629_v59 = vpop.eup %1628  ;;  %v1431_v60 = vmul.f32 %v1427_v54, %v1395_v30  ;;  %v1443_v61 = vmul.f32 %v1427_v54, %v1399_v35 }
 0x274   :  { %v1631_v56 = vpop.eup %1630  ;;  %v1434_v62 = vadd.f32 %v1430_v55, %v50_v53  ;;  %v1446_v3 = vadd.f32 %v1442_v57, %v50_v53  ;;  %v1428_v63 = vmul.f32 %v1629_v59, %v48_v31 }
 0x275   :  { %v1435_v4 = vadd.f32 %v1431_v60, %v51_v58  ;;  %v1447_v5 = vadd.f32 %v1443_v61, %v51_v58  ;;  %v1429_v8 = vmul.f32 %v1631_v56, %v49_v38 }
 0x276   :  { %1438 = vst [vmem:[%s2029_s7] sm:$0xff] %v1434_v62  ;;  %1450 = vst [vmem:[%s2029_s7 + $0x20] sm:$0xff] %v1446_v3  ;;  %v1432_v11 = vmul.f32 %v1428_v63, %v1396_v20  ;;  %v1444_v12 = vmul.f32 %v1428_v63, %v1400_v15 }
 0x277   :  { %1439 = vst [vmem:[%s2029_s7 + $0x8] sm:$0xff] %v1435_v4  ;;  %1451 = vst [vmem:[%s2029_s7 + $0x28] sm:$0xff] %v1447_v5  ;;  %v1433_v2 = vmul.f32 %v1429_v8, %v1397_v1  ;;  %v1445_v16 = vmul.f32 %v1429_v8, %v1401_v23 }
 0x278   :  { %v1436_v21 = vadd.f32 %v1432_v11, %v52_v6  ;;  %v1448_v14 = vadd.f32 %v1444_v12, %v52_v6 }
 0x279   :  { %v1437_v27 = vadd.f32 %v1433_v2, %v53_v13  ;;  %v1449_v0 = vadd.f32 %v1445_v16, %v53_v13 }
 0x27a   :  { %1440 = vst [vmem:[%s2029_s7 + $0x10] sm:$0xff] %v1436_v21  ;;  %1452 = vst [vmem:[%s2029_s7 + $0x30] sm:$0xff] %v1448_v14 }
 0x27b   :  { %1441 = vst [vmem:[%s2029_s7 + $0x18] sm:$0xff] %v1437_v27  ;;  %1453 = vst [vmem:[%s2029_s7 + $0x38] sm:$0xff] %v1449_v0 }

</bundles_post_ra>
